<compile_context>
chip_gen: v7x
topology: tpu7x:2x2x1
jax: 0.10.0
libtpu: 0.0.40
codegen_flags: <defaults>
</compile_context>

<pallas_src>
import functools

import jax
import jax.numpy as jnp
import numpy as np
from jax.experimental import pallas as pl
from jax.experimental.pallas import tpu as pltpu


def _round_up(v, m):
    return ((v + m - 1) // m) * m


def _apply_act(y, act_func):
    if act_func is None:
        return y
    if act_func == "relu":
        return jnp.maximum(y, 0.0)
    if act_func == "gelu":
        # TODO(synk): jax.nn.gelu is the tanh approximation; PyTorch nn.GELU
        # defaults to exact erf, so values differ slightly from the torch module.
        return jax.nn.gelu(y)
    raise ValueError(f"unsupported act_func: {act_func!r}")


def _make_nopool_kernel(act_func, n_tasks):
    """o[n, :, tile] = act(W @ x[n, :, tile] + b); no pooling."""

    def kernel(x_ref, w_ref, b_ref, o_ref):
        # x_ref: (C, L_TILE)  w_ref: (T_pad, C)  b_ref: (T_pad, 1)  o_ref: (T, L_TILE)
        y = jnp.dot(w_ref[...], x_ref[...], preferred_element_type=jnp.float32)
        y = _apply_act(y + b_ref[...], act_func)
        # Pallas masks the out-of-bounds lanes of the ragged last L block on store.
        o_ref[...] = y[:n_tasks].astype(o_ref.dtype)

    return kernel


def _make_pool_kernel(act_func, pool_func, n_tasks, *, true_l, l_tile, needs_mask):
    """Pooled path: elementwise-accumulate across L tiles in a wide VMEM
    accumulator (VPU), reduce across lanes once (XLU) and write the (T,1)
    output on the last tile."""
    # avg pool commutes with the linear 1x1 conv when there is no activation:
    # pool x first, then one tiny GEMV. Not valid with relu/gelu.
    pool_x_first = (pool_func == "avg" and act_func is None)

    def kernel(x_ref, w_ref, b_ref, o_ref, acc_ref):
        l = pl.program_id(1)
        last = pl.num_programs(1) - 1

        @pl.when(l == 0)
        def _():
            if pool_func == "max" and not pool_x_first:
                acc_ref[...] = jnp.full_like(acc_ref, -jnp.inf)
            else:
                acc_ref[...] = jnp.zeros_like(acc_ref)

        x = x_ref[...]                         # (C, L_TILE)
        valid = true_l - l * l_tile            # lanes of this tile holding real data

        if pool_x_first:
            xv = x.astype(jnp.float32)
            if needs_mask:
                lane = jax.lax.broadcasted_iota(jnp.int32, xv.shape, 1)
                xv = jnp.where(lane < valid, xv, 0.0)
            acc_ref[...] += xv                 # (C, L_TILE) elementwise, VPU
        else:
            y = jnp.dot(w_ref[...], x, preferred_element_type=jnp.float32)
            if act_func is not None:
                # Bias must be added before the (nonlinear) activation.
                y = _apply_act(y + b_ref[...], act_func)
            if needs_mask:
                lane = jax.lax.broadcasted_iota(jnp.int32, y.shape, 1)
                fill = 0.0 if pool_func == "avg" else -jnp.inf
                y = jnp.where(lane < valid, y, fill)
            if pool_func == "avg":
                acc_ref[...] += y              # (T_pad, L_TILE) elementwise, VPU
            else:  # max
                acc_ref[...] = jnp.maximum(acc_ref[...], y)

        @pl.when(l == last)
        def _():
            if pool_x_first:
                mean_x = jnp.sum(acc_ref[...], axis=-1, keepdims=True) * (1.0 / true_l)
                out = jnp.dot(w_ref[...], mean_x,
                              preferred_element_type=jnp.float32) + b_ref[...]
            elif pool_func == "avg":
                out = jnp.sum(acc_ref[...], axis=-1, keepdims=True) * (1.0 / true_l)
                if act_func is None:
                    out = out + b_ref[...]     # bias commutes with mean
            else:  # max
                out = jnp.max(acc_ref[...], axis=-1, keepdims=True)
                if act_func is None:
                    out = out + b_ref[...]     # bias commutes with max
            o_ref[...] = out[:n_tasks].astype(o_ref.dtype)

    return kernel


def _vmem_cap_bytes():
    """Generation-aware VMEM ceiling (physical minus compiler headroom)."""
    try:
        phys = int(pltpu.get_tpu_info().vmem_capacity_bytes)
    except Exception:
        phys = 64 << 20                        # conservative (v7x-sized) fallback
    return max(32 << 20, min(phys - (16 << 20), int(phys * 0.8)))


@functools.partial(jax.jit, static_argnames=("act_func", "pool_func", "max_l_tile"))
def conv_head_forward(x, weight, bias, *, act_func=None, pool_func=None,
                      max_l_tile=None):
    """ConvHead.forward.

    Args:
      x:      (N, C, L) input (NCL, like PyTorch Conv1d).
      weight: (T, C)    squeezed Conv1d kernel of shape (T, C, 1).
      bias:   (T,).
    Returns:
      (N, T, L) if pool_func is None else (N, T, 1).
    """
    N, C, L = x.shape
    T = weight.shape[0]
    itemsize = jnp.dtype(x.dtype).itemsize
    pool_x_first = (pool_func == "avg" and act_func is None)

    # ---- static tiling decisions -------------------------------------------
    # dtype-aware sublane alignment for W / bias rows (f32->8, bf16->16, i8->32).
    sub = max(8, 32 // itemsize)
    t_pad = _round_up(max(T, sub), sub)

    def vmem_needed(lt):
        lanes = _round_up(lt, 128)
        x_blk = _round_up(C, 8) * lanes * itemsize
        w_blk = t_pad * _round_up(C, 128) * itemsize
        b_blk = t_pad * 128 * 4
        if pool_func is None:
            out_blk = _round_up(T, 8) * lanes * itemsize
            scratch = 0
        else:
            out_blk = _round_up(T, 8) * 128 * itemsize
            rows = C if pool_x_first else t_pad
            scratch = _round_up(rows, 8) * lanes * 4
        # double-buffered blocks + scratch + slack
        return 2 * (x_blk + w_blk + b_blk + out_blk) + scratch + (2 << 20)

    # Byte-budget-driven lane tile (~2 MiB of x per block): per-grid-step
    # overhead (~0.35 us) dominates tiny blocks, so small C needs many lanes.
    target_x_bytes = 2 << 20
    l_budget = _round_up(max(128, target_x_bytes // max(1, C * itemsize)), 512)
    l_budget = min(l_budget, 64 * 1024)
    if max_l_tile is not None:
        l_budget = min(l_budget, max(128, (int(max_l_tile) // 128) * 128))
    # If one tile covers L, use the exact extent (full-dim block: no masking).
    l_tile = L if l_budget >= L else l_budget

    cap = _vmem_cap_bytes()
    while l_tile > 128 and vmem_needed(l_tile) > cap:
        l_tile = max(128, ((l_tile // 2) // 128) * 128)
    num_l = -(-L // l_tile)
    needs_mask = (L % l_tile) != 0

    # ---- tiny parameter prep (x and the output are NOT padded/sliced) -------
    w = weight
    b = bias
    if t_pad != T:
        w = jnp.pad(w, ((0, t_pad - T), (0, 0)))
        b = jnp.pad(b, ((0, t_pad - T),))
    w = w.astype(x.dtype)
    b2 = b.reshape(t_pad, 1).astype(jnp.float32)

    # ---- grid / specs --------------------------------------------------------
    in_specs = [
        pl.BlockSpec((None, C, l_tile), lambda n, l: (n, 0, l)),   # x, batch squeezed
        pl.BlockSpec((t_pad, C), lambda n, l: (0, 0)),             # W
        pl.BlockSpec((t_pad, 1), lambda n, l: (0, 0)),             # bias
    ]

    if pool_func is None:
        kernel = _make_nopool_kernel(act_func, T)
        out_shape = jax.ShapeDtypeStruct((N, T, L), x.dtype)
        out_spec = pl.BlockSpec((None, T, l_tile), lambda n, l: (n, 0, l))
        scratch_shapes = []
        dim_sem = ("parallel", "parallel")
        l_out = L
    else:
        kernel = _make_pool_kernel(act_func, pool_func, T,
                                   true_l=L, l_tile=l_tile, needs_mask=needs_mask)
        out_shape = jax.ShapeDtypeStruct((N, T, 1), x.dtype)
        out_spec = pl.BlockSpec((None, T, 1), lambda n, l: (n, 0, 0))
        acc_rows = C if pool_x_first else t_pad
        scratch_shapes = [pltpu.VMEM((acc_rows, l_tile), jnp.float32)]
        dim_sem = ("parallel", "arbitrary")   # L is a reduction axis; keep it last
        l_out = 1

    vmem_limit = int(min(max(vmem_needed(l_tile), 32 << 20), cap))

    cost = pl.CostEstimate(
        flops=2 * N * T * C * L,
        transcendentals=(N * T * L) if act_func == "gelu" else 0,
        bytes_accessed=itemsize * (N * C * L + T * C + T + N * T * l_out),
    )

    # TODO(synk): norm=True (BatchNorm1d) path not implemented; module default norm=False.
    out = pl.pallas_call(
        kernel,
        out_shape=out_shape,
        grid_spec=pltpu.PrefetchScalarGridSpec(
            num_scalar_prefetch=0,
            grid=(N, num_l),
            in_specs=in_specs,
            out_specs=out_spec,
            scratch_shapes=scratch_shapes,
        ),
        compiler_params=pltpu.CompilerParams(
            dimension_semantics=dim_sem,
            vmem_limit_bytes=vmem_limit,
        ),
        cost_estimate=cost,
    )(x, w, b2)
    return out


def conv_head_reference(x, weight, bias, *, act_func=None, pool_func=None):
    """Pure-JAX reference mirroring the PyTorch module semantics."""
    y = jnp.einsum("tc,ncl->ntl", weight, x) + bias[None, :, None]
    if act_func == "relu":
        y = jnp.maximum(y, 0.0)
    elif act_func == "gelu":
        y = jax.nn.gelu(y)
    if pool_func == "avg":
        y = jnp.mean(y, axis=-1, keepdims=True)
    elif pool_func == "max":
        y = jnp.max(y, axis=-1, keepdims=True)
    return y


if __name__ == "__main__":
    key = jax.random.PRNGKey(0)
    kx, kw, kb, kx2 = jax.random.split(key, 4)

    n_tasks, in_channels = 3, 4     # T, C
    weight = jax.random.normal(kw, (n_tasks, in_channels), dtype=jnp.float32) * 0.1
    bias = jax.random.normal(kb, (n_tasks,), dtype=jnp.float32) * 0.1

    # Small case (single short tile), a longer case (single full-extent tile),
    # and the longer case with a forced 256-lane tile to exercise cross-tile
    # accumulation + ragged-lane masking (1000 -> 4 tiles, last one ragged).
    x_small = jax.random.normal(kx, (2, in_channels, 16), dtype=jnp.float32)
    x_big = jax.random.normal(kx2, (2, in_channels, 1000), dtype=jnp.float32)

    configs = [
        (None, None), ("relu", None), ("gelu", None),
        (None, "avg"), ("relu", "avg"),
        (None, "max"), ("relu", "max"), ("gelu", "max"),
    ]
    cases = [(x_small, None), (x_big, None), (x_big, 256)]

    ok = True
    for x, mlt in cases:
        for act_func, pool_func in configs:
            out = conv_head_forward(x, weight, bias, act_func=act_func,
                                    pool_func=pool_func, max_l_tile=mlt)
            out = jax.block_until_ready(out)
            ref = conv_head_reference(x, weight, bias,
                                      act_func=act_func, pool_func=pool_func)
            if out.shape != ref.shape or not np.allclose(
                    np.asarray(out), np.asarray(ref), rtol=1e-5, atol=1e-5):
                ok = False
                print(f"MISMATCH act={act_func} pool={pool_func} "
                      f"shape={tuple(x.shape)} max_l_tile={mlt}")

    print("KERNEL_OK" if ok else "KERNEL_MISMATCH")
</pallas_src>

<mosaic_0001>
module attributes {stable_mosaic.version = 11 : i64} {
  func.func @kernel(%arg0: i32, %arg1: i32, %arg2: memref<1x4x16xf32, #tpu.memory_space<vmem>>, %arg3: memref<8x4xf32, #tpu.memory_space<vmem>>, %arg4: memref<8x1xf32, #tpu.memory_space<vmem>>, %arg5: memref<1x3x16xf32, #tpu.memory_space<vmem>>) attributes {dimension_semantics = [#tpu.dimension_semantics<parallel>, #tpu.dimension_semantics<parallel>], iteration_bounds = array<i64: 2, 1>, scalar_prefetch = 0 : i64, scratch_operands = 0 : i64, tpu.core_type = #tpu.core_type<tc>, window_params = [{transform_indices = @transform_0, window_bounds = array<i64: 1, 4, 16>}, {pipeline_mode = #tpu.pipeline_mode<synchronous>, transform_indices = @transform_1, window_bounds = array<i64: 8, 4>}, {pipeline_mode = #tpu.pipeline_mode<synchronous>, transform_indices = @transform_2, window_bounds = array<i64: 8, 1>}, {transform_indices = @transform_3, window_bounds = array<i64: 1, 3, 16>}]} {
    %c0 = arith.constant 0 : index
    %c0_0 = arith.constant 0 : index
    %0 = vector.load %arg3[%c0, %c0_0] : memref<8x4xf32, #tpu.memory_space<vmem>>, vector<8x4xf32>
    %c0_1 = arith.constant 0 : index
    %c0_2 = arith.constant 0 : index
    %c0_3 = arith.constant 0 : index
    %1 = vector.load %arg2[%c0_1, %c0_2, %c0_3] : memref<1x4x16xf32, #tpu.memory_space<vmem>>, vector<1x4x16xf32>
    %2 = vector.shape_cast %1 : vector<1x4x16xf32> to vector<4x16xf32>
    %cst = arith.constant dense<0.000000e+00> : vector<8x16xf32>
    %3 = tpu.matmul %0, %2, %cst {dimension_numbers = #tpu.dot_dimension_numbers<[1], [0], [0], [1], [0, 0, 1, 1], [], []>} : vector<8x4xf32>, vector<4x16xf32>, vector<8x16xf32> -> vector<8x16xf32>
    %c0_4 = arith.constant 0 : index
    %c0_5 = arith.constant 0 : index
    %4 = vector.load %arg4[%c0_4, %c0_5] : memref<8x1xf32, #tpu.memory_space<vmem>>, vector<8x1xf32>
    %5 = vector.broadcast %4 : vector<8x1xf32> to vector<8x16xf32>
    %6 = arith.addf %3, %5 : vector<8x16xf32>
    %7 = vector.extract_strided_slice %6 {offsets = [0, 0], sizes = [3, 16], strides = [1, 1]} : vector<8x16xf32> to vector<3x16xf32>
    %c0_6 = arith.constant 0 : index
    %c0_7 = arith.constant 0 : index
    %c0_8 = arith.constant 0 : index
    %8 = vector.load %arg5[%c0_6, %c0_7, %c0_8] : memref<1x3x16xf32, #tpu.memory_space<vmem>>, vector<1x3x16xf32>
    %9 = vector.shape_cast %8 : vector<1x3x16xf32> to vector<3x16xf32>
    %10 = vector.shape_cast %7 : vector<3x16xf32> to vector<1x3x16xf32>
    tpu.vector_store %arg5[%c0_6, %c0_7, %c0_8], %10 {strides = array<i32>} : memref<1x3x16xf32, #tpu.memory_space<vmem>>, vector<1x3x16xf32>,
    return
  }
  func.func @transform_0(%arg0: i32, %arg1: i32) -> (i32, i32, i32) {
    %c0_i32 = arith.constant 0 : i32
    %c0_i32_0 = arith.constant 0 : i32
    return %arg0, %c0_i32, %arg1 : i32, i32, i32
  }
  func.func @transform_1(%arg0: i32, %arg1: i32) -> (i32, i32) {
    %c0_i32 = arith.constant 0 : i32
    %c0_i32_0 = arith.constant 0 : i32
    %c0_i32_1 = arith.constant 0 : i32
    return %c0_i32, %c0_i32_0 : i32, i32
  }
  func.func @transform_2(%arg0: i32, %arg1: i32) -> (i32, i32) {
    %c0_i32 = arith.constant 0 : i32
    %c0_i32_0 = arith.constant 0 : i32
    %c0_i32_1 = arith.constant 0 : i32
    return %c0_i32, %c0_i32_0 : i32, i32
  }
  func.func @transform_3(%arg0: i32, %arg1: i32) -> (i32, i32, i32) {
    %c0_i32 = arith.constant 0 : i32
    %c0_i32_0 = arith.constant 0 : i32
    return %arg0, %c0_i32, %arg1 : i32, i32, i32
  }
}

</mosaic_0001>

<bundles_post_ra>
// kernel: conv_head_forward.1
= control target key start
LH: loop header
LB: loop body
LE: loop exit
PB: predicated region body
PF: predicated region fallthrough
CT: control target
= control target key end

     0   :  { %s452_s12 = smov 0   ;;  %s454_s13 = smov 0   ;;  %s491_s0 = inlined_call_operand.vmem [shape: f32[2,4,16], index: 0, kind: input, shape index: {}]   ;;  %s492_s1 = inlined_call_operand.vmem [shape: f32[8,4], index: 1, kind: input, shape index: {}]   ;;  %s493_s2 = inlined_call_operand.vmem [shape: f32[8,1], index: 2, kind: input, shape index: {}]   ;;  %s494_s3 = inlined_call_operand.vmem [shape: f32[2,3,16], index: 3, kind: output, shape index: {}]  }
   0x1   :  { %s456_s14 = smov 0  }
   0x2 LB: > { %s25_s15 = sadd.s32 1, %s423_s13  ;;  %p363_p0 = scmp.ge.s32.totalorder %s427_s14, 1  ;;  %s427_s14 = sphi %s456_s14, %s13_s14   ;;  %s423_s13 = sphi %s454_s13, %s496_s13   ;;  %s419_s12 = sphi %s452_s12, %s495_s12  }
   0x3   : > { %p27_p1 = scmp.ge.s32.totalorder %s25_s15, 2  ;;  %p155_p2 = scmp.lt.s32.totalorder %s427_s14, 3 }
   0x5   : > { %s498_s15 = smov (%p27_p1, %s25_s15), 0  ;;  %p156_p3 = pnand %p363_p0, %p155_p2 }
   0x6   : > { %p183_p4 = scmp.lt.s32.totalorder (!%p156_p3), %s419_s12, 1  ;;  %v429_v0 = vmov (!%p156_p3), 0.0   ;;  %vm430_vm0 = vmmov (!%p156_p3), 0   ;;  %v199_v1 = vld [vmem:[%s493_s2] sm:$0xff] (!%p156_p3)  ;;  %v431_v2 = vmov (!%p156_p3), 0   ;;  %vm209_vm1 = vcmask (!%p156_p3), 1043456  }
   0x7   : > { %159 = sbr.rel (%p156_p3) target bundleno = 234 (0xea), region = 32  ;;  %372 = vmatprep.subr.mxu0 (!%p156_p3), %v429_v0  ;;  %374 = vmatprep.mubr.msk.f32.mxu0 (!%p156_p3), %vm430_vm0, %v429_v0  ;;  %v197_v3 = vld [vmem:[%s492_s1] sm:$0xff] (!%p156_p3)  ;;  %vm205_vm2 = vcmask (!%p156_p3), 31744   ;;  %vm283_vm3 = vcmask (!%p156_p3), 124928  }
   0x8   : > { %404 = vset.pattern.permute.xlu0 (!%p156_p3), %v431_v2 }
   0x9   : > { %202 = vperm.xlu0 (!%p156_p3), %404, %v199_v1  }
   0xe   : > { %s500_s12 = smov (!%p183_p4, %s419_s12), 1 }
   0xf   : > { %s364_s18 = sshll.u32 %s500_s12, 2 }
  0x10   : > { %s189_s21 = scalar_lea.vmem %s491_s0, %s364_s18  ;;  %s196_s26 = scalar_lea.vmem %s494_s3, %s364_s18 }
  0x11   : > { %v198_v4 = vld [vmem:[%s189_s21] sm:$0xf] }
  0x12   : > { %373 = vmatpush3.msk.msra.mxu0 %vm209_vm1, %v198_v4 }
  0x13   : > { %375 = vmatmul.mubr.msk.f32.vlgmr.msra.gmra.mrb[0].mxu0 %vm205_vm2, %v197_v3 }
  0x88   : > { %v203_v5 = vpop.permute.xlu0 %202 }
  0xe6   : > { %v279_v6 = vpop.f32.mrb[0].mxu0 }
  0xe7   : > { %v280_v7 = vadd.f32 %v279_v6, %v203_v5  ;;  %v376_v8 = vpop.f32.mrb[1].mxu0 }
  0xe9   : > { %284 = vst.msk [vmem:[%s196_s26] sm:$0x7] %vm283_vm3, %v280_v7 }
  0xea PF: > { %s13_s14 = sadd.s32 1, %s427_s14   ;;  %s495_s12 = smov %s423_s13 }
  0xeb   : > { %p10_p5 = scmp.ge.s32.totalorder %s13_s14, 4   ;;  %s496_s13 = smov %s498_s15 }
  0xed   :  { %12 = sbr.rel (!%p10_p5) target bundleno = 2 (0x2), region = 62 }

</bundles_post_ra>
